<compile_context>
chip_gen: v6e
topology: v6e:2x2x1
jax: 0.10.0
libtpu: 0.0.40
codegen_flags: <defaults>
</compile_context>

<pallas_src>
import math

import numpy as np
import jax
import jax.numpy as jnp
from jax.experimental import pallas as pl
from jax.experimental.pallas import tpu as pltpu

STATE_SIZE = 32   # small synthetic sizes consistent with the FC module
ACTION_SIZE = 4
HIDDEN = 256

_LANE = 128       # vreg lane width
_SUBLANE = 8      # f32 sublane count
_MAX_TILE_ROWS = 1024   # 1024x128xf32 block = 512 KiB; x4 buffers = 2 MiB VMEM


def init_params(key):
    """Deterministic initialization of all module parameters (unused in forward)."""
    ks = jax.random.split(key, 10)

    def lin(kw, kb, fan_in, fan_out):
        bound = 1.0 / math.sqrt(fan_in)
        w = jax.random.uniform(kw, (fan_out, fan_in), jnp.float32, -bound, bound)
        b = jax.random.uniform(kb, (fan_out,), jnp.float32, -bound, bound)
        return w, b

    return {
        "actor_fc": lin(ks[0], ks[1], STATE_SIZE, HIDDEN),
        "critic_fc1": lin(ks[2], ks[3], STATE_SIZE, HIDDEN),
        "critic_fc2": lin(ks[4], ks[5], HIDDEN, 1),
        "mu": lin(ks[6], ks[7], HIDDEN, ACTION_SIZE),
        "std": lin(ks[8], ks[9], HIDDEN, ACTION_SIZE),
    }


def _copy_kernel(x_ref, o_ref):
    # Forward pass of ContActorCritic is `return x` — pure pass-through.
    o_ref[...] = x_ref[...]


def _pick_tile_rows(rows):
    """Largest multiple of 8 that divides `rows`, capped at _MAX_TILE_ROWS."""
    if rows <= _MAX_TILE_ROWS:
        return rows
    tb = _MAX_TILE_ROWS
    while rows % tb != 0:
        tb -= _SUBLANE   # terminates: rows is a multiple of 8
    return tb


def cont_actor_critic_forward(params, x):
    """Matches ContActorCritic.forward(x) -> x exactly (params are unused).

    The identity is executed on-device via an aliased Pallas copy kernel; the
    output buffer aliases the input buffer, so no new HBM output is allocated.
    """
    del params  # unused by the reference forward pass
    B, D = x.shape
    total = B * D

    lane_dense = (total % (_SUBLANE * _LANE) == 0) and (x.dtype.itemsize == 4)

    if lane_dense:
        # Lane-dense slab: view (B, D) as (rows, 128) so stores are full-width
        # (no masked vst), and tile the row axis for DMA/compute pipelining.
        rows = total // _LANE
        tb = _pick_tile_rows(rows)
        xr = x.reshape(rows, _LANE)
        y = pl.pallas_call(
            _copy_kernel,
            out_shape=jax.ShapeDtypeStruct((rows, _LANE), x.dtype),
            grid_spec=pl.GridSpec(
                grid=(rows // tb,),
                in_specs=[pl.BlockSpec((tb, _LANE), lambda i: (i, 0))],
                out_specs=pl.BlockSpec((tb, _LANE), lambda i: (i, 0)),
            ),
            input_output_aliases={0: 0},
            compiler_params=pltpu.CompilerParams(
                dimension_semantics=("parallel",)),  # shard rows across TCs (v7x)
        )(xr)
        return y.reshape(B, D)

    # Tiny / non-lane-aligned fallback: single full-array block (legal since
    # the block equals the full array dims), still aliased in-place.
    return pl.pallas_call(
        _copy_kernel,
        out_shape=jax.ShapeDtypeStruct((B, D), x.dtype),
        grid_spec=pl.GridSpec(
            grid=(1,),
            in_specs=[pl.BlockSpec((B, D), lambda i: (0, 0))],
            out_specs=pl.BlockSpec((B, D), lambda i: (0, 0)),
        ),
        input_output_aliases={0: 0},
        compiler_params=pltpu.CompilerParams(
            dimension_semantics=("arbitrary",)),
    )(x)


if __name__ == "__main__":
    key = jax.random.PRNGKey(0)
    k_params, k_x, k_big = jax.random.split(key, 3)

    params = init_params(k_params)

    # Small shape consistent with the module: batch=2, STATE_SIZE=32.
    x = jax.random.normal(k_x, (2, STATE_SIZE), dtype=jnp.float32)
    x_host = np.asarray(x)  # host copy (the device input may be aliased/donated)
    y = jax.block_until_ready(cont_actor_critic_forward(params, x))
    assert y.shape == x_host.shape and y.dtype == x_host.dtype
    assert np.array_equal(np.asarray(y), x_host)

    # Larger batch exercises the lane-dense, batch-tiled, dual-core path.
    xb = jax.random.normal(k_big, (8192, STATE_SIZE), dtype=jnp.float32)
    xb_host = np.asarray(xb)
    yb = jax.block_until_ready(cont_actor_critic_forward(params, xb))
    assert yb.shape == xb_host.shape and yb.dtype == xb_host.dtype
    assert np.array_equal(np.asarray(yb), xb_host)

    print("KERNEL_OK")
</pallas_src>

<mosaic_0001>
module attributes {stable_mosaic.version = 11 : i64} {
  func.func @_copy_kernel(%arg0: i32, %arg1: memref<2x32xf32, #tpu.memory_space<vmem>>, %arg2: memref<2x32xf32, #tpu.memory_space<vmem>>) attributes {dimension_semantics = [#tpu.dimension_semantics<arbitrary>], iteration_bounds = array<i64: 1>, scalar_prefetch = 0 : i64, scratch_operands = 0 : i64, tpu.core_type = #tpu.core_type<tc>, window_params = [{pipeline_mode = #tpu.pipeline_mode<synchronous>, transform_indices = @transform_0, window_bounds = array<i64: 2, 32>}, {pipeline_mode = #tpu.pipeline_mode<synchronous>, transform_indices = @transform_1, window_bounds = array<i64: 2, 32>}]} {
    %c0 = arith.constant 0 : index
    %c0_0 = arith.constant 0 : index
    %0 = vector.load %arg1[%c0, %c0_0] : memref<2x32xf32, #tpu.memory_space<vmem>>, vector<2x32xf32>
    %c0_1 = arith.constant 0 : index
    %c0_2 = arith.constant 0 : index
    %1 = vector.load %arg2[%c0_1, %c0_2] : memref<2x32xf32, #tpu.memory_space<vmem>>, vector<2x32xf32>
    tpu.vector_store %arg2[%c0_1, %c0_2], %0 {strides = array<i32>} : memref<2x32xf32, #tpu.memory_space<vmem>>, vector<2x32xf32>,
    return
  }
  func.func @transform_0(%arg0: i32) -> (i32, i32) {
    %c0_i32 = arith.constant 0 : i32
    %c0_i32_0 = arith.constant 0 : i32
    %c0_i32_1 = arith.constant 0 : i32
    return %c0_i32, %c0_i32_0 : i32, i32
  }
  func.func @transform_1(%arg0: i32) -> (i32, i32) {
    %c0_i32 = arith.constant 0 : i32
    %c0_i32_0 = arith.constant 0 : i32
    %c0_i32_1 = arith.constant 0 : i32
    return %c0_i32, %c0_i32_0 : i32, i32
  }
}

</mosaic_0001>

<bundles_post_ra>
// kernel: tpu_custom_call.1
= control target key start
LH: loop header
LB: loop body
LE: loop exit
PB: predicated region body
PF: predicated region fallthrough
CT: control target
= control target key end

     0   :  { %6 = vsyncpa [#allocation3], 0  ;;  %s103_s0 = inlined_call_operand.hbm [shape: f32[2,32], index: 0, kind: input, shape index: {}, may-alias: {0,1}]   ;;  %s104_s1 = inlined_call_operand.hbm [shape: f32[2,32], index: 1, kind: output, shape index: {}, may-alias: {0,1}]  }
   0x1   :  { %7 = vsyncpa [#allocation4], 0  ;;  %s85_s6 = smov [#allocation2]  }
   0x2   :  { %s14_s7 = sshll.u32 %s85_s6, 4  ;;  %s15_s7 = int_to_ptr.vmem [resolvable:$true] %s14_s7 }
   0x3   :  { %s49_s8 = scalar_lea.vmem %s15_s7, 32  ;;  %p54_p1 = scmp.lt.s32.totalorder %s15_s7, %s15_s7 }
   0x4   :  { %p50_p0 = scmp.ne.s32.totalorder %s15_s7, %s49_s8  ;;  %p55_p2 = scmp.lt.s32.totalorder %s49_s8, %s49_s8 }
   0x6   :  { %p56_p3 = por %p55_p2, %p54_p1 }
   0x8   :  { %p57_p4 = pnand %p56_p3, %p50_p0 }
   0xa   :  { %60 = shalt.err (!%p57_p4)
}
   0xb   :  { %17 = dma.hbm_to_vmem [thread:$0]  %s103_s0, 32, %s15_s7, [#allocation3]  }
   0xc   :  { %81 = dma.done.wait [#allocation3], 32  }
   0xd   :  { %82 = vsyncadd [#allocation3], 4294967264  ;;  %s86_s11 = smov [#allocation5]   ;;  %vm22_vm0 = vcmask 254976   ;;  %v21_v0 = vld [vmem:[#allocation2] sm:$0x3] }
   0xe   :  { %s30_s12 = sshll.u32 %s86_s11, 4  ;;  %23 = vst.msk [vmem:[#allocation5] sm:$0x3] %vm22_vm0, %v21_v0  ;;  %s31_s12 = int_to_ptr.vmem [resolvable:$true] %s30_s12 }
   0xf   :  { %s61_s13 = scalar_lea.vmem %s31_s12, 32  ;;  %p66_p6 = scmp.lt.s32.totalorder %s31_s12, %s31_s12 }
  0x10   :  { %p62_p5 = scmp.ne.s32.totalorder %s31_s12, %s61_s13  ;;  %p67_p7 = scmp.lt.s32.totalorder %s61_s13, %s61_s13 }
  0x12   :  { %p68_p8 = por %p67_p7, %p66_p6 }
  0x14   :  { %p69_p9 = pnand %p68_p8, %p62_p5 }
  0x16   :  { %72 = shalt.err (!%p69_p9)
}
  0x17   :  { %33 = dma.vmem_to_hbm [thread:$0]  %s31_s12, 32, %s104_s1, [#allocation4]  }
  0x18   :  { %83 = dma.done.wait [#allocation4], 32  }
  0x19   :  { %84 = vsyncadd [#allocation4], 4294967264 }
  0x1a   :  { %37 = vsyncpa [#allocation3], 1 }
  0x1b   :  { %38 = vsyncpa [#allocation4], 1 }

</bundles_post_ra>
